<compile_context>
chip_gen: v7x
topology: tpu7x:2x2x1
jax: 0.10.0
libtpu: 0.0.40
codegen_flags: <defaults>
</compile_context>

<pallas_src>
import functools

import jax
import jax.numpy as jnp
from jax.experimental import pallas as pl
from jax.experimental.pallas import tpu as pltpu

_LANE = 128      # vreg lane width
_SUBLANE = 8     # vreg sublane count (f32)


def _round_up(x, m):
    return (x + m - 1) // m * m


def _rnn_tag_kernel(x_ref, w_ih_ref, w_hh_ref, b_comb_ref, wtag_ref, btag_ref,
                    out_ref, h_carry, hs_scratch, *, unroll):
    """One S-chunk of the vanilla RNN + per-chunk hidden->tag projection.

    x_ref      : (tS, Bp, E)   time-major embedding chunk (compute dtype)
    w_ih_ref   : (E, H)        W_ih^T                     (compute dtype)
    w_hh_ref   : (H, H)        W_hh^T                     (compute dtype)
    b_comb_ref : (1, H)        b_ih + b_hh                (f32)
    wtag_ref   : (H, Tp)       W_tag^T zero-padded to Tp = multiple of 128
    btag_ref   : (1, Tp)       b_tag zero-padded          (f32)
    out_ref    : (tS, Bp, Tp)  tag scores for this chunk  (f32)
    h_carry    : (Bp, H)       recurrent state carried across grid steps (f32)
    hs_scratch : (tS*Bp, H)    input projections, overwritten with hidden states
    """
    tS, Bp, E = x_ref.shape
    H = h_carry.shape[-1]
    Tp = out_ref.shape[-1]
    cdt = x_ref.dtype                        # MXU operand dtype (f32 / bf16)

    # h_0 = 0 at the first chunk; otherwise carried from the previous chunk.
    @pl.when(pl.program_id(0) == 0)
    def _():
        h_carry[...] = jnp.zeros_like(h_carry)

    # --- Hoisted input projection: ONE batched MXU matmul for the chunk. ---
    # xproj = x_chunk @ W_ih^T + (b_ih + b_hh)          -> (tS*Bp, H) f32
    x2d = x_ref[...].reshape(tS * Bp, E)
    hs_scratch[...] = (
        jnp.dot(x2d, w_ih_ref[...], preferred_element_type=jnp.float32)
        + b_comb_ref[...])

    w_hh = w_hh_ref[...]                     # hoist loop-invariant load

    # --- Serial recurrence: per step only  h = tanh(xproj[t] + h @ W_hh^T). ---
    def step(t, h_prev):
        row = pl.multiple_of(t * Bp, Bp)
        xp_t = hs_scratch[pl.ds(row, Bp), :]                       # (Bp, H) f32
        h = jnp.tanh(
            xp_t + jnp.dot(h_prev.astype(cdt), w_hh,
                           preferred_element_type=jnp.float32))    # (Bp, H) f32
        hs_scratch[pl.ds(row, Bp), :] = h                          # store hidden
        return h

    h_last = jax.lax.fori_loop(0, tS, step, h_carry[...], unroll=unroll)
    h_carry[...] = h_last

    # --- Tag projection: lane-dense batched matmul for the whole chunk. ---
    out_ref[...] = (
        jnp.dot(hs_scratch[...].astype(wtag_ref.dtype), wtag_ref[...],
                preferred_element_type=jnp.float32)
        + btag_ref[...]).reshape(tS, Bp, Tp).astype(out_ref.dtype)


def rnn_pos_tagging_forward(sentence, emb_weights,
                            w_ih, w_hh, b_ih, b_hh, w_tag, b_tag,
                            compute_dtype=jnp.float32, s_chunk=64):
    """Full forward: embedding gather (JAX glue) + S-chunked Pallas RNN kernel.

    sentence     : (B, S) int32 token ids
    emb_weights  : (V, E) frozen embedding table
    w_ih         : (H, E), w_hh: (H, H), b_ih/b_hh: (H,)   nn.RNN parameters
    w_tag        : (T, H), b_tag: (T,)                     nn.Linear parameters
    compute_dtype: MXU operand dtype (use jnp.bfloat16 on v5e/v6e/v7x for
                   2-3x MXU throughput; accumulation / recurrent state stay f32)
    s_chunk      : sequence-chunk length per grid step
    returns      : (B, S, T) float32 tag scores
    """
    B, S = sentence.shape
    E = emb_weights.shape[1]
    H = w_ih.shape[0]
    T = w_tag.shape[0]

    Bp = _round_up(max(B, _SUBLANE), _SUBLANE)            # sublane-pad batch
    Tp = _round_up(max(T, _LANE), _LANE)                  # lane-dense tag dim
    tS = min(s_chunk, S)                                  # chunk length
    Sp = _round_up(S, tS)                                 # pad S to chunk grid

    # Gather directly into time-major, batch/time-padded layout: pad the
    # *token ids* (cheap int32) instead of the embedded slab.
    sent_t = jnp.transpose(sentence)                                 # (S, B)
    sent_p = jnp.pad(sent_t, ((0, Sp - S), (0, Bp - B)))             # pad with id 0
    x = jnp.take(emb_weights.astype(compute_dtype), sent_p, axis=0)  # (Sp, Bp, E)

    w_ih_t = jnp.transpose(w_ih).astype(compute_dtype)               # (E, H)
    w_hh_t = jnp.transpose(w_hh).astype(compute_dtype)               # (H, H)
    b_comb = (b_ih + b_hh).reshape(1, H).astype(jnp.float32)         # (1, H)

    w_tag_p = jnp.zeros((H, Tp), compute_dtype).at[:, :T].set(
        jnp.transpose(w_tag).astype(compute_dtype))                  # (H, Tp)
    b_tag_p = jnp.zeros((1, Tp), jnp.float32).at[:, :T].set(
        b_tag.reshape(1, T).astype(jnp.float32))                     # (1, Tp)

    unroll = True if tS <= 16 else 8
    kernel = functools.partial(_rnn_tag_kernel, unroll=unroll)

    # VMEM budget (double-buffered chunks + weights + scratch) with headroom.
    itemsize = jnp.dtype(compute_dtype).itemsize
    vmem_est = 2 * tS * Bp * E * itemsize                 # x chunk (dbl buf)
    vmem_est += 2 * tS * Bp * Tp * 4                      # out chunk (dbl buf)
    vmem_est += 2 * ((E * H + H * H + H * Tp) * itemsize + (H + Tp) * 4)
    vmem_est += (Bp * H + tS * Bp * H) * 4                # scratch
    vmem_limit = min(max(2 * vmem_est + (4 << 20), 16 << 20), 64 << 20)

    out3 = pl.pallas_call(
        kernel,
        out_shape=jax.ShapeDtypeStruct((Sp, Bp, Tp), jnp.float32),
        grid=(Sp // tS,),
        in_specs=[
            pl.BlockSpec((tS, Bp, E), lambda s: (s, 0, 0)),
            pl.BlockSpec((E, H), lambda s: (0, 0)),
            pl.BlockSpec((H, H), lambda s: (0, 0)),
            pl.BlockSpec((1, H), lambda s: (0, 0)),
            pl.BlockSpec((H, Tp), lambda s: (0, 0)),
            pl.BlockSpec((1, Tp), lambda s: (0, 0)),
        ],
        out_specs=pl.BlockSpec((tS, Bp, Tp), lambda s: (s, 0, 0)),
        scratch_shapes=[
            pltpu.VMEM((Bp, H), jnp.float32),             # recurrent carry
            pltpu.VMEM((tS * Bp, H), jnp.float32),        # xproj / hidden states
        ],
        compiler_params=pltpu.CompilerParams(
            dimension_semantics=("arbitrary",),
            vmem_limit_bytes=vmem_limit),
    )(x, w_ih_t, w_hh_t, b_comb, w_tag_p, b_tag_p)

    out = out3[:S, :B, :T]                                # drop S/B/T padding
    return jnp.transpose(out, (1, 0, 2))                  # (B, S, T)


def _reference_forward(sentence, emb_weights, w_ih, w_hh, b_ih, b_hh, w_tag, b_tag):
    """Pure-JAX reference (lax.scan) for correctness checking."""
    embeds = jnp.take(emb_weights, sentence, axis=0)      # (B, S, E)
    B, S, E = embeds.shape
    H = w_ih.shape[0]
    x = jnp.transpose(embeds, (1, 0, 2))                  # (S, B, E)

    def step(h, x_t):
        h_new = jnp.tanh(x_t @ w_ih.T + b_ih + h @ w_hh.T + b_hh)
        return h_new, h_new

    h0 = jnp.zeros((B, H), jnp.float32)
    _, hs = jax.lax.scan(step, h0, x)                     # (S, B, H)
    rnn_out = jnp.transpose(hs, (1, 0, 2))                # (B, S, H)
    return rnn_out @ w_tag.T + b_tag                      # (B, S, T)


if __name__ == "__main__":
    # Small, deterministic synthetic configuration.
    V = 20           # vocab size
    E = 32           # embedding_dim
    H = 32           # hidden_dim
    T = 10           # target_size
    B = 2            # batch
    S = 8            # sequence length
    padding_idx = 0

    key = jax.random.PRNGKey(0)
    k_emb, k_wih, k_whh, k_bih, k_bhh, k_wtag, k_btag, k_sent = \
        jax.random.split(key, 8)

    emb_weights = jax.random.normal(k_emb, (V, E), jnp.float32) * 0.5
    # mimic a zero padding row in the pretrained embedding matrix
    emb_weights = emb_weights.at[padding_idx].set(0.0)

    w_ih = jax.random.normal(k_wih, (H, E), jnp.float32) * 0.1
    w_hh = jax.random.normal(k_whh, (H, H), jnp.float32) * 0.1
    b_ih = jax.random.normal(k_bih, (H,), jnp.float32) * 0.1
    b_hh = jax.random.normal(k_bhh, (H,), jnp.float32) * 0.1
    w_tag = jax.random.normal(k_wtag, (T, H), jnp.float32) * 0.1
    b_tag = jax.random.normal(k_btag, (T,), jnp.float32) * 0.1

    sentence = jax.random.randint(k_sent, (B, S), 0, V, dtype=jnp.int32)

    ref = _reference_forward(sentence, emb_weights,
                             w_ih, w_hh, b_ih, b_hh, w_tag, b_tag)
    ref = jax.block_until_ready(ref)

    # f32 MXU-operand path (bit-tight vs. the f32 reference); s_chunk=4 so the
    # demo exercises the multi-chunk grid and the cross-chunk hidden carry.
    out = rnn_pos_tagging_forward(sentence, emb_weights,
                                  w_ih, w_hh, b_ih, b_hh, w_tag, b_tag,
                                  compute_dtype=jnp.float32, s_chunk=4)
    out = jax.block_until_ready(out)
    assert out.shape == (B, S, T), out.shape
    assert jnp.allclose(out, ref, atol=1e-4, rtol=1e-4), \
        float(jnp.max(jnp.abs(out - ref)))

    # bf16 MXU-operand path (f32 accumulation / recurrent state) — the fast
    # path on v5e/v6e/v7x; looser tolerance for bf16 operand rounding.
    out_bf16 = rnn_pos_tagging_forward(sentence, emb_weights,
                                       w_ih, w_hh, b_ih, b_hh, w_tag, b_tag,
                                       compute_dtype=jnp.bfloat16, s_chunk=4)
    out_bf16 = jax.block_until_ready(out_bf16)
    assert out_bf16.shape == (B, S, T), out_bf16.shape
    assert jnp.allclose(out_bf16, ref, atol=5e-2, rtol=5e-2), \
        float(jnp.max(jnp.abs(out_bf16 - ref)))

    print("KERNEL_OK")
</pallas_src>

<mosaic_0001>
module attributes {stable_mosaic.version = 11 : i64} {
  func.func @_rnn_tag_kernel(%arg0: i32, %arg1: memref<4x8x32xf32, #tpu.memory_space<vmem>>, %arg2: memref<32x32xf32, #tpu.memory_space<vmem>>, %arg3: memref<32x32xf32, #tpu.memory_space<vmem>>, %arg4: memref<1x32xf32, #tpu.memory_space<vmem>>, %arg5: memref<32x128xf32, #tpu.memory_space<vmem>>, %arg6: memref<1x128xf32, #tpu.memory_space<vmem>>, %arg7: memref<4x8x128xf32, #tpu.memory_space<vmem>>, %arg8: memref<8x32xf32, #tpu.memory_space<vmem>>, %arg9: memref<32x32xf32, #tpu.memory_space<vmem>>) attributes {dimension_semantics = [#tpu.dimension_semantics<arbitrary>], iteration_bounds = array<i64: 2>, scalar_prefetch = 0 : i64, scratch_operands = 2 : i64, tpu.core_type = #tpu.core_type<tc>, window_params = [{transform_indices = @transform_0, window_bounds = array<i64: 4, 8, 32>}, {pipeline_mode = #tpu.pipeline_mode<synchronous>, transform_indices = @transform_1, window_bounds = array<i64: 32, 32>}, {pipeline_mode = #tpu.pipeline_mode<synchronous>, transform_indices = @transform_2, window_bounds = array<i64: 32, 32>}, {pipeline_mode = #tpu.pipeline_mode<synchronous>, transform_indices = @transform_3, window_bounds = array<i64: 1, 32>}, {pipeline_mode = #tpu.pipeline_mode<synchronous>, transform_indices = @transform_4, window_bounds = array<i64: 32, 128>}, {pipeline_mode = #tpu.pipeline_mode<synchronous>, transform_indices = @transform_5, window_bounds = array<i64: 1, 128>}, {transform_indices = @transform_6, window_bounds = array<i64: 4, 8, 128>}]} {
    %c0_i32 = arith.constant 0 : i32
    %0 = arith.cmpi eq, %arg0, %c0_i32 : i32
    %1 = arith.extui %0 : i1 to i32
    %c0_i32_0 = arith.constant 0 : i32
    %2 = arith.cmpi ne, %1, %c0_i32_0 : i32
    scf.if %2 {
      %cst_41 = arith.constant 0.000000e+00 : f32
      %58 = vector.broadcast %cst_41 : f32 to vector<8x32xf32>
      %c0_42 = arith.constant 0 : index
      %c0_43 = arith.constant 0 : index
      %59 = vector.load %arg8[%c0_42, %c0_43] : memref<8x32xf32, #tpu.memory_space<vmem>>, vector<8x32xf32>
      tpu.vector_store %arg8[%c0_42, %c0_43], %58 {strides = array<i32>} : memref<8x32xf32, #tpu.memory_space<vmem>>, vector<8x32xf32>,
    } else {
    }
    %c0 = arith.constant 0 : index
    %c0_1 = arith.constant 0 : index
    %c0_2 = arith.constant 0 : index
    %3 = vector.load %arg1[%c0, %c0_1, %c0_2] : memref<4x8x32xf32, #tpu.memory_space<vmem>>, vector<4x8x32xf32>
    %4 = vector.shape_cast %3 : vector<4x8x32xf32> to vector<32x32xf32>
    %c0_3 = arith.constant 0 : index
    %c0_4 = arith.constant 0 : index
    %5 = vector.load %arg2[%c0_3, %c0_4] : memref<32x32xf32, #tpu.memory_space<vmem>>, vector<32x32xf32>
    %cst = arith.constant dense<0.000000e+00> : vector<32x32xf32>
    %6 = tpu.matmul %4, %5, %cst {dimension_numbers = #tpu.dot_dimension_numbers<[1], [0], [0], [1], [0, 0, 1, 1], [], []>} : vector<32x32xf32>, vector<32x32xf32>, vector<32x32xf32> -> vector<32x32xf32>
    %c0_5 = arith.constant 0 : index
    %c0_6 = arith.constant 0 : index
    %7 = vector.load %arg4[%c0_5, %c0_6] : memref<1x32xf32, #tpu.memory_space<vmem>>, vector<1x32xf32>
    %8 = vector.broadcast %7 : vector<1x32xf32> to vector<32x32xf32>
    %9 = arith.addf %6, %8 : vector<32x32xf32>
    %c0_7 = arith.constant 0 : index
    %c0_8 = arith.constant 0 : index
    %10 = vector.load %arg9[%c0_7, %c0_8] : memref<32x32xf32, #tpu.memory_space<vmem>>, vector<32x32xf32>
    tpu.vector_store %arg9[%c0_7, %c0_8], %9 {strides = array<i32>} : memref<32x32xf32, #tpu.memory_space<vmem>>, vector<32x32xf32>,
    %c0_9 = arith.constant 0 : index
    %c0_10 = arith.constant 0 : index
    %11 = vector.load %arg3[%c0_9, %c0_10] : memref<32x32xf32, #tpu.memory_space<vmem>>, vector<32x32xf32>
    %c0_11 = arith.constant 0 : index
    %c0_12 = arith.constant 0 : index
    %12 = vector.load %arg8[%c0_11, %c0_12] : memref<8x32xf32, #tpu.memory_space<vmem>>, vector<8x32xf32>
    %c0_i32_13 = arith.constant 0 : i32
    %c8_i32 = arith.constant 8 : i32
    %13 = arith.muli %c0_i32_13, %c8_i32 : i32
    %14 = tpu.assume_multiple %13, 8 : i32
    %15 = arith.index_cast %14 : i32 to index
    %c0_14 = arith.constant 0 : index
    %16 = vector.load %arg9[%15, %c0_14] : memref<32x32xf32, #tpu.memory_space<vmem>>, vector<8x32xf32>
    %cst_15 = arith.constant dense<0.000000e+00> : vector<8x32xf32>
    %17 = tpu.matmul %12, %11, %cst_15 {dimension_numbers = #tpu.dot_dimension_numbers<[1], [0], [0], [1], [0, 0, 1, 1], [], []>} : vector<8x32xf32>, vector<32x32xf32>, vector<8x32xf32> -> vector<8x32xf32>
    %18 = arith.addf %16, %17 : vector<8x32xf32>
    %19 = math.tanh %18 : vector<8x32xf32>
    %20 = arith.index_cast %14 : i32 to index
    %c0_16 = arith.constant 0 : index
    %21 = vector.load %arg9[%20, %c0_16] : memref<32x32xf32, #tpu.memory_space<vmem>>, vector<8x32xf32>
    tpu.vector_store %arg9[%20, %c0_16], %19 {strides = array<i32>} : memref<32x32xf32, #tpu.memory_space<vmem>>, vector<8x32xf32>,
    %c1_i32 = arith.constant 1 : i32
    %c8_i32_17 = arith.constant 8 : i32
    %22 = arith.muli %c1_i32, %c8_i32_17 : i32
    %23 = tpu.assume_multiple %22, 8 : i32
    %24 = arith.index_cast %23 : i32 to index
    %c0_18 = arith.constant 0 : index
    %25 = vector.load %arg9[%24, %c0_18] : memref<32x32xf32, #tpu.memory_space<vmem>>, vector<8x32xf32>
    %cst_19 = arith.constant dense<0.000000e+00> : vector<8x32xf32>
    %26 = tpu.matmul %19, %11, %cst_19 {dimension_numbers = #tpu.dot_dimension_numbers<[1], [0], [0], [1], [0, 0, 1, 1], [], []>} : vector<8x32xf32>, vector<32x32xf32>, vector<8x32xf32> -> vector<8x32xf32>
    %27 = arith.addf %25, %26 : vector<8x32xf32>
    %28 = math.tanh %27 : vector<8x32xf32>
    %29 = arith.index_cast %23 : i32 to index
    %c0_20 = arith.constant 0 : index
    %30 = vector.load %arg9[%29, %c0_20] : memref<32x32xf32, #tpu.memory_space<vmem>>, vector<8x32xf32>
    tpu.vector_store %arg9[%29, %c0_20], %28 {strides = array<i32>} : memref<32x32xf32, #tpu.memory_space<vmem>>, vector<8x32xf32>,
    %c2_i32 = arith.constant 2 : i32
    %c8_i32_21 = arith.constant 8 : i32
    %31 = arith.muli %c2_i32, %c8_i32_21 : i32
    %32 = tpu.assume_multiple %31, 8 : i32
    %33 = arith.index_cast %32 : i32 to index
    %c0_22 = arith.constant 0 : index
    %34 = vector.load %arg9[%33, %c0_22] : memref<32x32xf32, #tpu.memory_space<vmem>>, vector<8x32xf32>
    %cst_23 = arith.constant dense<0.000000e+00> : vector<8x32xf32>
    %35 = tpu.matmul %28, %11, %cst_23 {dimension_numbers = #tpu.dot_dimension_numbers<[1], [0], [0], [1], [0, 0, 1, 1], [], []>} : vector<8x32xf32>, vector<32x32xf32>, vector<8x32xf32> -> vector<8x32xf32>
    %36 = arith.addf %34, %35 : vector<8x32xf32>
    %37 = math.tanh %36 : vector<8x32xf32>
    %38 = arith.index_cast %32 : i32 to index
    %c0_24 = arith.constant 0 : index
    %39 = vector.load %arg9[%38, %c0_24] : memref<32x32xf32, #tpu.memory_space<vmem>>, vector<8x32xf32>
    tpu.vector_store %arg9[%38, %c0_24], %37 {strides = array<i32>} : memref<32x32xf32, #tpu.memory_space<vmem>>, vector<8x32xf32>,
    %c3_i32 = arith.constant 3 : i32
    %c8_i32_25 = arith.constant 8 : i32
    %40 = arith.muli %c3_i32, %c8_i32_25 : i32
    %41 = tpu.assume_multiple %40, 8 : i32
    %42 = arith.index_cast %41 : i32 to index
    %c0_26 = arith.constant 0 : index
    %43 = vector.load %arg9[%42, %c0_26] : memref<32x32xf32, #tpu.memory_space<vmem>>, vector<8x32xf32>
    %cst_27 = arith.constant dense<0.000000e+00> : vector<8x32xf32>
    %44 = tpu.matmul %37, %11, %cst_27 {dimension_numbers = #tpu.dot_dimension_numbers<[1], [0], [0], [1], [0, 0, 1, 1], [], []>} : vector<8x32xf32>, vector<32x32xf32>, vector<8x32xf32> -> vector<8x32xf32>
    %45 = arith.addf %43, %44 : vector<8x32xf32>
    %46 = math.tanh %45 : vector<8x32xf32>
    %47 = arith.index_cast %41 : i32 to index
    %c0_28 = arith.constant 0 : index
    %48 = vector.load %arg9[%47, %c0_28] : memref<32x32xf32, #tpu.memory_space<vmem>>, vector<8x32xf32>
    tpu.vector_store %arg9[%47, %c0_28], %46 {strides = array<i32>} : memref<32x32xf32, #tpu.memory_space<vmem>>, vector<8x32xf32>,
    %c4_i32 = arith.constant 4 : i32
    %c0_29 = arith.constant 0 : index
    %c0_30 = arith.constant 0 : index
    %49 = vector.load %arg8[%c0_29, %c0_30] : memref<8x32xf32, #tpu.memory_space<vmem>>, vector<8x32xf32>
    tpu.vector_store %arg8[%c0_29, %c0_30], %46 {strides = array<i32>} : memref<8x32xf32, #tpu.memory_space<vmem>>, vector<8x32xf32>,
    %c0_31 = arith.constant 0 : index
    %c0_32 = arith.constant 0 : index
    %50 = vector.load %arg9[%c0_31, %c0_32] : memref<32x32xf32, #tpu.memory_space<vmem>>, vector<32x32xf32>
    %c0_33 = arith.constant 0 : index
    %c0_34 = arith.constant 0 : index
    %51 = vector.load %arg5[%c0_33, %c0_34] : memref<32x128xf32, #tpu.memory_space<vmem>>, vector<32x128xf32>
    %cst_35 = arith.constant dense<0.000000e+00> : vector<32x128xf32>
    %52 = tpu.matmul %50, %51, %cst_35 {dimension_numbers = #tpu.dot_dimension_numbers<[1], [0], [0], [1], [0, 0, 1, 1], [], []>} : vector<32x32xf32>, vector<32x128xf32>, vector<32x128xf32> -> vector<32x128xf32>
    %c0_36 = arith.constant 0 : index
    %c0_37 = arith.constant 0 : index
    %53 = vector.load %arg6[%c0_36, %c0_37] : memref<1x128xf32, #tpu.memory_space<vmem>>, vector<1x128xf32>
    %54 = vector.broadcast %53 : vector<1x128xf32> to vector<32x128xf32>
    %55 = arith.addf %52, %54 : vector<32x128xf32>
    %56 = vector.shape_cast %55 : vector<32x128xf32> to vector<4x8x128xf32>
    %c0_38 = arith.constant 0 : index
    %c0_39 = arith.constant 0 : index
    %c0_40 = arith.constant 0 : index
    %57 = vector.load %arg7[%c0_38, %c0_39, %c0_40] : memref<4x8x128xf32, #tpu.memory_space<vmem>>, vector<4x8x128xf32>
    tpu.vector_store %arg7[%c0_38, %c0_39, %c0_40], %56 {strides = array<i32>} : memref<4x8x128xf32, #tpu.memory_space<vmem>>, vector<4x8x128xf32>,
    return
  }
  func.func @transform_0(%arg0: i32) -> (i32, i32, i32) {
    %c0_i32 = arith.constant 0 : i32
    %c0_i32_0 = arith.constant 0 : i32
    %c0_i32_1 = arith.constant 0 : i32
    return %arg0, %c0_i32, %c0_i32_0 : i32, i32, i32
  }
  func.func @transform_1(%arg0: i32) -> (i32, i32) {
    %c0_i32 = arith.constant 0 : i32
    %c0_i32_0 = arith.constant 0 : i32
    %c0_i32_1 = arith.constant 0 : i32
    return %c0_i32, %c0_i32_0 : i32, i32
  }
  func.func @transform_2(%arg0: i32) -> (i32, i32) {
    %c0_i32 = arith.constant 0 : i32
    %c0_i32_0 = arith.constant 0 : i32
    %c0_i32_1 = arith.constant 0 : i32
    return %c0_i32, %c0_i32_0 : i32, i32
  }
  func.func @transform_3(%arg0: i32) -> (i32, i32) {
    %c0_i32 = arith.constant 0 : i32
    %c0_i32_0 = arith.constant 0 : i32
    %c0_i32_1 = arith.constant 0 : i32
    return %c0_i32, %c0_i32_0 : i32, i32
  }
  func.func @transform_4(%arg0: i32) -> (i32, i32) {
    %c0_i32 = arith.constant 0 : i32
    %c0_i32_0 = arith.constant 0 : i32
    %c0_i32_1 = arith.constant 0 : i32
    return %c0_i32, %c0_i32_0 : i32, i32
  }
  func.func @transform_5(%arg0: i32) -> (i32, i32) {
    %c0_i32 = arith.constant 0 : i32
    %c0_i32_0 = arith.constant 0 : i32
    %c0_i32_1 = arith.constant 0 : i32
    return %c0_i32, %c0_i32_0 : i32, i32
  }
  func.func @transform_6(%arg0: i32) -> (i32, i32, i32) {
    %c0_i32 = arith.constant 0 : i32
    %c0_i32_0 = arith.constant 0 : i32
    %c0_i32_1 = arith.constant 0 : i32
    return %arg0, %c0_i32, %c0_i32_0 : i32, i32, i32
  }
}

</mosaic_0001>

<bundles_post_ra>
// kernel: tpu_custom_call.1
= control target key start
LH: loop header
LB: loop body
LE: loop exit
PB: predicated region body
PF: predicated region fallthrough
CT: control target
= control target key end

     0   :  { %11 = vsyncpa [#allocation5], 0  ;;  %s1822_s0 = inlined_call_operand.hbm [shape: f32[8,8,32], index: 0, kind: input, shape index: {}]   ;;  %s1823_s1 = inlined_call_operand.hbm [shape: f32[32,32], index: 1, kind: input, shape index: {}]   ;;  %s1824_s2 = inlined_call_operand.hbm [shape: f32[32,32], index: 2, kind: input, shape index: {}]   ;;  %s1825_s3 = inlined_call_operand.vmem [shape: f32[1,32], index: 3, kind: input, shape index: {}]   ;;  %s1826_s4 = inlined_call_operand.hbm [shape: f32[32,128], index: 4, kind: input, shape index: {}]   ;;  %s1827_s5 = inlined_call_operand.vmem [shape: f32[1,128], index: 5, kind: input, shape index: {}]   ;;  %s1828_s6 = inlined_call_operand.hbm [shape: f32[8,8,128], index: 6, kind: output, shape index: {}]  }
   0x1   :  { %13 = vsyncpa [#allocation5 + $0x1], 0 }
   0x2   :  { %14 = vsyncpa [#allocation8], 0 }
   0x3   :  { %15 = vsyncpa [#allocation11], 0 }
   0x4   :  { %16 = vsyncpa [#allocation6], 0 }
   0x5   :  { %18 = vsyncpa [#allocation6 + $0x1], 0  ;;  %s1504_s21 = smov 0   ;;  %s1506_s22 = smov 0  }
   0x6   :  { %s1508_s23 = smov 0   ;;  %s1510_s24 = smov 0  }
   0x7 LB: > { %s1525_s25 = sadd.s32 4294967295, %s1454_s24   ;;  %s988_s26 = sadd.s32 4294967294, %s1454_s24   ;;  %s1454_s24 = sphi %s1510_s24, %s1852_s24   ;;  %s1450_s23 = sphi %s1508_s23, %s1851_s23   ;;  %s1446_s22 = sphi %s1506_s22, %s1850_s22   ;;  %s1442_s21 = sphi %s1504_s21, %s1849_s21  }
   0x8   : > { %p44_p0 = scmp.ne.s32.totalorder %s1446_s22, %s1442_s21  ;;  %p1829_p1 = scmp.eq.s32.totalorder %s1525_s25, 0 }
   0x9   : > { %p179_p3 = scmp.eq.s32.totalorder %s988_s26, 1  ;;  %p989_p5 = scmp.ge.s32.totalorder %s1454_s24, 1 }
   0xa   : > { %p1534_p4 = por %p1829_p1, %p44_p0  ;;  %p186_p7 = scmp.lt.s32.totalorder %s1454_s24, 3 }
   0xb   : > { %p1539_p6 = por %p179_p3, %p44_p0  ;;  %s1456_s30 = smov [#allocation7]  }
   0xc   : > { %s1832_s27 = scalar_select %p1534_p4, 1, 0 }
   0xd   : > { %s1833_s28 = scalar_select %p1539_p6, 1, 0 }
   0xe   : > { %p1545_p9 = pnand %p989_p5, %p186_p7  ;;  %s198_s7 = sshll.u32 %s1456_s30, 4  ;;  %s1549_s7 = int_to_ptr.vmem [resolvable:$true] %s198_s7 }
   0xf   : > { %s1457_s9 = smov [#allocation9]   ;;  %s1458_s11 = smov [#allocation10]  }
  0x10   : > { %s1834_s29 = scalar_select %p1545_p9, 1, 0 }
  0x11   : > { %p1189_p10 = pneg %p1545_p9  ;;  %s211_s10 = sshll.u32 %s1457_s9, 4  ;;  %s1560_s10 = int_to_ptr.vmem [resolvable:$true] %s211_s10 }
  0x12   : > { %s1562_s12 = sshll.u32 %s1458_s11, 4  ;;  %s1266_s15 = scalar_lea.hbm %s1823_s1, 512  ;;  %s228_s12 = int_to_ptr.vmem [resolvable:$true] %s1562_s12 }
  0x13   : > { %p1556_p12 = pnand %p1189_p10, %p1829_p1  ;;  %p1267_p13 = scmp.ne.s32.totalorder %s1823_s1, %s1266_s15 }
  0x14   : > { %p1273_p7 = scmp.lt.u32.totalorder %s1266_s15, %s1823_s1 }
  0x15   : > { %p1572_p0 = pneg %p1556_p12 }
  0x17   : > { %p1269_p3 = pnand %p1572_p0, %p1267_p13 }
  0x19   : > { %p1270_p5 = pneg %p1269_p3 }
  0x1b   : > { %p1275_p10 = pnand %p1273_p7, %p1270_p5 }
  0x1d   : > { %1278 = shalt.err (!%p1275_p10)
}
  0x1e   : > { %s1279_s26 = scalar_lea.vmem %s1549_s7, 512  ;;  %p1287_p2 = scmp.lt.s32.totalorder %s1549_s7, %s1549_s7 }
  0x1f   : > { %p1280_p11 = scmp.ne.s32.totalorder %s1549_s7, %s1279_s26  ;;  %p1288_p6 = scmp.lt.s32.totalorder %s1279_s26, %s1279_s26 }
  0x21   : > { %p1282_p8 = pnand %p1280_p11, %p1572_p0  ;;  %p1289_p13 = por %p1288_p6, %p1287_p2 }
  0x23   : > { %p1283_p1 = pneg %p1282_p8 }
  0x25   : > { %p1290_p3 = pnand %p1289_p13, %p1283_p1 }
  0x27   : > { %1293 = shalt.err (!%p1290_p3)
}
  0x28   : > { %s1459_s30 = smov 128   ;;  %s1460_s9 = smov 8  }
  0x29   : > { %1192 = dma.hbm_to_vmem [thread:$0]  (!%p1556_p12), %s1823_s1, 512, %s1549_s7, [#allocation8], %s1459_s30, %s1459_s30, %s1460_s9  }
  0x2a   : > { %s1294_s16 = scalar_lea.hbm %s1824_s2, 512 }
  0x2b   : > { %p1295_p1 = scmp.ne.s32.totalorder %s1824_s2, %s1294_s16  ;;  %p1301_p8 = scmp.lt.u32.totalorder %s1294_s16, %s1824_s2 }
  0x2d   : > { %p1297_p2 = pnand %p1295_p1, %p1572_p0 }
  0x2f   : > { %p1298_p6 = pneg %p1297_p2 }
  0x31   : > { %p1303_p11 = pnand %p1301_p8, %p1298_p6 }
  0x33   : > { %1306 = shalt.err (!%p1303_p11)
}
  0x34   : > { %s1307_s7 = scalar_lea.vmem %s1560_s10, 512  ;;  %p1315_p13 = scmp.lt.s32.totalorder %s1560_s10, %s1560_s10 }
  0x35   : > { %p1308_p5 = scmp.ne.s32.totalorder %s1560_s10, %s1307_s7  ;;  %p1316_p3 = scmp.lt.s32.totalorder %s1307_s7, %s1307_s7 }
  0x37   : > { %p1310_p7 = pnand %p1308_p5, %p1572_p0  ;;  %p1317_p1 = por %p1316_p3, %p1315_p13 }
  0x39   : > { %p1311_p10 = pneg %p1310_p7 }
  0x3b   : > { %p1318_p2 = pnand %p1317_p1, %p1311_p10 }
  0x3d   : > { %1321 = shalt.err (!%p1318_p2)
}
  0x3e   : > { %1195 = dma.hbm_to_vmem [thread:$0]  (!%p1556_p12), %s1824_s2, 512, %s1560_s10, [#allocation8], %s1459_s30, %s1459_s30, %s1460_s9  }
  0x3f   : > { %s1322_s16 = scalar_lea.hbm %s1826_s4, 512 }
  0x40   : > { %p1323_p6 = scmp.ne.s32.totalorder %s1826_s4, %s1322_s16  ;;  %p1329_p5 = scmp.lt.u32.totalorder %s1322_s16, %s1826_s4 }
  0x42   : > { %p1325_p8 = pnand %p1323_p6, %p1572_p0 }
  0x44   : > { %p1326_p11 = pneg %p1325_p8 }
  0x46   : > { %p1331_p7 = pnand %p1329_p5, %p1326_p11 }
  0x48   : > { %1334 = shalt.err (!%p1331_p7)
}
  0x49   : > { %s1335_s7 = scalar_lea.vmem %s228_s12, 512  ;;  %p1343_p1 = scmp.lt.s32.totalorder %s228_s12, %s228_s12 }
  0x4a   : > { %p1336_p10 = scmp.ne.s32.totalorder %s228_s12, %s1335_s7  ;;  %p1344_p2 = scmp.lt.s32.totalorder %s1335_s7, %s1335_s7 }
  0x4c   : > { %p1338_p13 = pnand %p1336_p10, %p1572_p0  ;;  %p1345_p4 = por %p1344_p2, %p1343_p1 }
  0x4e   : > { %p1339_p3 = pneg %p1338_p13 }
  0x50   : > { %p1346_p9 = pnand %p1345_p4, %p1339_p3 }
  0x52   : > { %1349 = shalt.err (!%p1346_p9)
}
  0x53   : > { %1198 = dma.hbm_to_vmem [thread:$0]  (!%p1556_p12), %s1826_s4, 512, %s228_s12, [#allocation11], %s1459_s30, %s1459_s30, %s1460_s9  }
  0x54   : > { %s1645_s18 = sadd.s32 1, %s1454_s24   ;;  %s31_s13 = sadd.s32 1, %s1450_s23 }
  0x55   : > { %s28_s8 = ssub.s32 %s1454_s24, %s1645_s18  ;;  %p38_p9 = scmp.ne.s32.totalorder %s1450_s23, %s1446_s22 }
  0x56   : > { %p29_p4 = scmp.eq.s32.totalorder %s28_s8, 0  ;;  %p39_p0 = scmp.eq.s32.totalorder %s1454_s24, 0 }
  0x57   : > { %p1210_p6 = scmp.lt.s32.totalorder %s1454_s24, 2  ;;  %p1837_p11 = scmp.eq.s32.totalorder %s1525_s25, 1 }
  0x58   : > { %s1655_s14 = scalar_select %p29_p4, %s1450_s23, %s31_s13  }
  0x59   : > { %p40_p8 = por %p39_p0, %p38_p9  ;;  %p1659_p5 = por %p1837_p11, %p38_p9 }
  0x5a   : > { %s244_s16 = sand.u32 1, %s1450_s23   ;;  %s1023_s17 = sshll.u32 %s1454_s24, 9 }
  0x5b   : > { %s994_s12 = sshll.u32 %s244_s16, 5  ;;  %s1668_s26 = scalar_lea.hbm %s1822_s0, %s1023_s17 }
  0x5c   : > { %s248_s7 = scalar_lea.vmem [#allocation4], %s994_s12  ;;  %p1670_p12 = pnand %p1210_p6, %p40_p8 }
  0x5d   : > { %s255_s10 = sshll.u32 %s248_s7, 4  ;;  %s1676_s8 = scalar_lea.sflag [#allocation5], %s244_s16  ;;  %s1674_s10 = int_to_ptr.vmem [resolvable:$true] %s255_s10 }
  0x5e   : > { %s1350_s13 = scalar_lea.hbm %s1668_s26, 512  ;;  %p1352_p10 = pneg %p1670_p12 }
  0x5f   : > { %p1351_p7 = scmp.ne.s32.totalorder %s1668_s26, %s1350_s13  ;;  %s1355_s19 = scalar_lea.hbm %s1822_s0, 1024 }
  0x60   : > { %p1356_p1 = scmp.lt.u32.totalorder %s1668_s26, %s1822_s0  ;;  %p1357_p2 = scmp.lt.u32.totalorder %s1355_s19, %s1350_s13 }
  0x61   : > { %p1353_p13 = pnand %p1352_p10, %p1351_p7  ;;  %p1359_p9 = scmp.lt.u32.totalorder %s1350_s13, %s1668_s26 }
  0x62   : > { %p1358_p4 = por %p1357_p2, %p1356_p1 }
  0x63   : > { %p1354_p3 = pneg %p1353_p13 }
  0x64   : > { %p1360_p0 = por %p1359_p9, %p1358_p4 }
  0x66   : > { %p1361_p6 = pnand %p1360_p0, %p1354_p3 }
  0x68   : > { %1364 = shalt.err (!%p1361_p6)
}
  0x69   : > { %s1365_s16 = scalar_lea.vmem %s1674_s10, 512  ;;  %s1461_s17 = smov [#allocation4]  }
  0x6a   : > { %p1366_p8 = scmp.ne.s32.totalorder %s1674_s10, %s1365_s16  ;;  %s1370_s12 = sshll.u32 %s1461_s17, 4  ;;  %s1371_s12 = int_to_ptr.vmem [resolvable:$false] %s1370_s12 }
  0x6b   : > { %s1372_s20 = scalar_lea.vmem %s1371_s12, 1024  ;;  %p1373_p13 = scmp.lt.s32.totalorder %s1674_s10, %s1371_s12 }
  0x6c   : > { %p1368_p11 = pnand %p1366_p8, %p1352_p10  ;;  %p1374_p1 = scmp.lt.s32.totalorder %s1372_s20, %s1365_s16 }
  0x6e   : > { %p1369_p7 = pneg %p1368_p11  ;;  %p1375_p2 = por %p1374_p1, %p1373_p13 }
  0x70   : > { %p1376_p4 = pnand %p1375_p2, %p1369_p7 }
  0x72   : > { %1379 = shalt.err (!%p1376_p4)
}
  0x73   : > { %1202 = dma.hbm_to_vmem [thread:$0]  (!%p1670_p12), %s1668_s26, 512, %s1674_s10, %s1676_s8, %s1459_s30, %s1459_s30, %s1460_s9  }
  0x74   : > { %p1840_p10 = scmp.ne.s32.totalorder %s1834_s29, 0 }
  0x75   : > { %s1710_s13 = sand.u32 (!%p1840_p10), 1, %s1446_s22   ;;  %p1841_p3 = scmp.ne.s32.totalorder (!%p1840_p10), %s1832_s27, 0 }
  0x76   : > { %267 = sbr.rel (%p1840_p10) target bundleno = 1302 (0x516), region = 44  ;;  %s998_s19 = sshll.u32 (!%p1840_p10), %s1710_s13, 5 }
  0x77   : > { %s270_s7 = scalar_lea.sflag (!%p1840_p10), [#allocation5], %s1710_s13  ;;  %s1714_s16 = scalar_lea.vmem (!%p1840_p10), [#allocation4], %s998_s19 }
  0x7d   : > { %1425 = dma.done.wait (%p1841_p3), %s270_s7, 512  }
  0x7e   : > { %1427 = vsyncadd (%p1841_p3), %s270_s7, 4294966784  ;;  %p1842_p12 = scmp.eq.s32.totalorder %s1525_s25, 0 }
  0x80   : > { %1429 = dma.done.wait (%p1842_p12), [#allocation8], 1024   ;;  %p1843_p9 = pmov %p1842_p12 }
  0x82   : > { %1431 = vsyncadd (%p1843_p9), [#allocation8], 4294966272  ;;  %p1844_p0 = pmov %p1843_p9 }
  0x84   : > { %1433 = dma.done.wait (%p1844_p0), [#allocation11], 512   ;;  %p1845_p6 = pmov %p1844_p0 }
  0x85   : > { %s1728_s29 = scalar_lea.vmem [#allocation12], %s998_s19  ;;  %p1846_p8 = scmp.ne.s32.totalorder %s1525_s25, 0 }
  0x86   : > { %1435 = vsyncadd (%p1845_p6), [#allocation11], 4294966784  ;;  %vm320_vm0 = vcmask (!%p1846_p8), 261120   ;;  %v1462_v0 = vmov (!%p1846_p8), 0.0  }
  0x87   : > { %319 = sbr.rel (%p1846_p8) target bundleno = 142 (0x8e), region = 64  ;;  %321 = vst.msk [vmem:[#allocation2] sm:$0xff] (!%p1846_p8), %vm320_vm0, %v1462_v0 }
  0x8e PF: > { %v326_v1 = vld [vmem:[#allocation7] sm:$0xff]  ;;  %v327_v2 = vld [vmem:[#allocation7 + $0x8] sm:$0xff]  ;;  %v328_v3 = vld [vmem:[#allocation7 + $0x10] sm:$0xff]  ;;  %vm337_vm1 = vcmask 261120   ;;  %v1463_v7 = vmov 0.0|0.0   ;;  %vm1464_vm2 = vmmov 0  }
  0x8f   : > { %v1133_v4 = vpack.c.bf16 %v327_v2, %v326_v1  ;;  %v329_v5 = vld [vmem:[#allocation7 + $0x18] sm:$0xff]  ;;  %v322_v6 = vld [vmem:[%s1714_s16] sm:$0xff]  ;;  %1141 = vmatprep.subr.bf16.mxu1 %v1463_v7  ;;  %v440_v10 = vld [vmem:[#allocation9 + $0x8] sm:$0xff]  ;;  %v1465_v12 = vmov 0.0   ;;  %s1024_s10 = sshll.u32 %s1525_s25, 9  ;;  %s886_s11 = sshll.u32 %s1728_s29, 4  ;;  %s1776_s11 = int_to_ptr.vmem [resolvable:$true] %s886_s11 }
  0x90   : > { %v1137_v8 = vpack.c.bf16 %v329_v5, %v328_v3  ;;  %1069 = vmatprep.mubr.msk.f32.mxu0 %vm337_vm1, %v322_v6  ;;  %v439_v9 = vld [vmem:[#allocation9] sm:$0xff]  ;;  %v441_v11 = vld [vmem:[#allocation9 + $0x10] sm:$0xff]  ;;  %1083 = vmatprep.mubr.msk.f32.mxu1 %vm1464_vm2, %v1465_v12  ;;  %v442_v14 = vld [vmem:[#allocation9 + $0x18] sm:$0xff]  ;;  %s1774_s12 = scalar_lea.hbm %s1828_s6, %s1024_s10  ;;  %s873_s20 = scalar_lea.sflag [#allocation6], %s1710_s13 }
  0x91   : > { %1134 = vmatprep.subr.bf16.mxu0 %v1133_v4  ;;  %v1142_v13 = vpack.c.bf16 %v440_v10, %v439_v9  ;;  %v1145_v15 = vpack.c.bf16 %v442_v14, %v441_v11  ;;  %v323_v16 = vld [vmem:[%s1714_s16 + $0x8] sm:$0xff]  ;;  %v443_v17 = vld [vmem:[#allocation2] sm:$0xff]  ;;  %v324_v18 = vld [vmem:[%s1714_s16 + $0x10] sm:$0xff]  ;;  %s1380_s19 = scalar_lea.vmem %s1776_s11, 512  ;;  %s1466_s25 = smov [#allocation12]  }
  0x92   : > { %1136 = vmatpush3.bf16.msra.mxu0 %v1133_v4  ;;  %v325_v19 = vld [vmem:[%s1714_s16 + $0x18] sm:$0xff]  ;;  %v760_v34 = vld [vmem:[#allocation10] sm:$0xff]  ;;  %v761_v35 = vld [vmem:[#allocation10 + $0x8] sm:$0xff]  ;;  %p1381_p11 = scmp.ne.s32.totalorder %s1776_s11, %s1380_s19  ;;  %s1384_s7 = sshll.u32 %s1466_s25, 4  ;;  %s1385_s7 = int_to_ptr.vmem [resolvable:$false] %s1384_s7 }
  0x93   : > { %1138 = vmatprep.subr.bf16.mxu0 %v1137_v8  ;;  %1143 = vmatpush3.bf16.msra.mxu1 %v1142_v13  ;;  %v1004_v20 = vld [vmem:[%s1825_s3] ss:$0 sm:$0xff]  ;;  %v1165_v36 = vpack.c.bf16 %v761_v35, %v760_v34  ;;  %v762_v41 = vld [vmem:[#allocation10 + $0x10] sm:$0xff]  ;;  %s1386_s16 = scalar_lea.vmem %s1385_s7, 1024  ;;  %p1387_p1 = scmp.lt.s32.totalorder %s1776_s11, %s1385_s7 }
  0x94   : > { %1144 = vmatprep.subr.bf16.mxu1 %v1463_v7  ;;  %v763_v42 = vld [vmem:[#allocation10 + $0x18] sm:$0xff]  ;;  %p1382_p7 = pnand %p1381_p11, %p1659_p5  ;;  %p1388_p2 = scmp.lt.s32.totalorder %s1386_s16, %s1380_s19 }
  0x95   : > { %v1169_v43 = vpack.c.bf16 %v763_v42, %v762_v41  ;;  %v1013_v51 = vld [vmem:[%s1827_s5] ss:$0 sm:$0xff] }
  0x96   : > { %1140 = vmatpush3.bf16.msra.mxu0 %v1137_v8  ;;  %p1383_p13 = pneg %p1382_p7  ;;  %p1389_p4 = por %p1388_p2, %p1387_p1 }
  0x97   : > { %1146 = vmatpush3.bf16.msra.mxu1 %v1145_v15  ;;  %1147 = vmatprep.subr.bf16.mxu0 %v1463_v7 }
  0x98   : > { %1153 = vmatprep.subr.bf16.mxu1 %v1463_v7  ;;  %p1390_p10 = pnand %p1389_p4, %p1383_p13 }
  0x99   : > { %1070 = vmatmul.mubr.msk.f32.vlgmr.msra.gmra.mrb[0].mxu0 %vm337_vm1, %v323_v16 }
  0x9a   : > { %1084 = vmatmul.mubr.msk.f32.vlgmr.msra.gmra.mrb[0].mxu1 %vm337_vm1, %v443_v17  ;;  %1149 = vmatpush3.bf16.msra.mxu0 %v1142_v13 }
  0x9b   : > { %1150 = vmatprep.subr.bf16.mxu0 %v1463_v7  ;;  %1155 = vmatpush3.bf16.msra.mxu1 %v1142_v13 }
  0x9c   : > { %1156 = vmatprep.subr.bf16.mxu1 %v1463_v7  ;;  %1105 = vmatprep.mubr.msk.f32.mxu1 %vm1464_vm2, %v1465_v12 }
  0x9d   : > { %1072 = vmatprep.mubr.msk.f32.mxu0 %vm337_vm1, %v324_v18 }
  0x9e   : > { %1152 = vmatpush3.bf16.msra.mxu0 %v1145_v15 }
  0x9f   : > { %1158 = vmatpush3.bf16.msra.mxu1 %v1145_v15  ;;  %1159 = vmatprep.subr.bf16.mxu0 %v1463_v7 }
  0xa0   : > { %1073 = vmatmul.mubr.msk.f32.gmra.mrb[2].mxu0 %vm337_vm1, %v325_v19  ;;  %1166 = vmatprep.subr.bf16.mxu1 %v1165_v36 }
  0xa1   : > { %1094 = vmatprep.mubr.msk.f32.mxu0 %vm1464_vm2, %v1465_v12 }
 0x16c   : > { %v1071_v21 = vpop.f32.mrb[0].mxu0 }
 0x16d   : > { %v422_v22 = vadd.f32 %v1071_v21, %v1004_v20  ;;  %v416_v23 = vpop.f32.mrb[1].mxu0  ;;  %v514_v24 = vpop.f32.mrb[0].mxu1 }
 0x16e   : > { %v417_v25 = vadd.f32 %v1004_v20, %v416_v23  ;;  %v1085_v26 = vpop.f32.mrb[1].mxu1 }
 0x16f   : > { %436 = vst.msk [vmem:[#allocation3 + $0x8] sm:$0xff] %vm337_vm1, %v422_v22 }
 0x170   : > { %435 = vst.msk [vmem:[#allocation3] sm:$0xff] %vm337_vm1, %v417_v25 }
 0x173   : > { %v1074_v30 = vpop.f32.mrb[2].mxu0 }
 0x174   : > { %v432_v31 = vadd.f32 %v1074_v30, %v1004_v20  ;;  %v426_v32 = vpop.f32.mrb[3].mxu0 }
 0x175   : > { %v427_v33 = vadd.f32 %v1004_v20, %v426_v32 }
 0x176   : > { %438 = vst.msk [vmem:[#allocation3 + $0x18] sm:$0xff] %vm337_vm1, %v432_v31  ;;  %v522_v37 = vld [vmem:[#allocation3 + $0x8] sm:$0xff] }
 0x177   : > { %v444_v27 = vld [vmem:[#allocation3] sm:$0xff]  ;;  %437 = vst.msk [vmem:[#allocation3 + $0x10] sm:$0xff] %vm337_vm1, %v427_v33 }
 0x178   : > { %v518_v28 = vadd.f32 %v514_v24, %v444_v27 }
 0x17a   : > { %1258 = vtanh.f32 %v518_v28 }
 0x17d   : > { %v678_v58 = vld [vmem:[#allocation3 + $0x18] sm:$0xff] }
 0x17e   : > { %v600_v47 = vld [vmem:[#allocation3 + $0x10] sm:$0xff] }
 0x184   : > { %v1259_v29 = vpop.eup %1258 }
 0x185   : > { %520 = vst.msk [vmem:[#allocation3] sm:$0xff] %vm337_vm1, %v1259_v29  ;;  %1095 = vmatmul.mubr.msk.f32.vlgmr.msra.gmra.mrb[4].mxu0 %vm337_vm1, %v1259_v29 }
 0x186   : > { %1161 = vmatpush3.bf16.msra.mxu0 %v1142_v13  ;;  %1116 = vmatprep.mubr.msk.f32.mxu0 %vm1464_vm2, %v1465_v12 }
 0x187   : > { %1162 = vmatprep.subr.bf16.mxu0 %v1463_v7 }
 0x18a   : > { %1164 = vmatpush3.bf16.msra.mxu0 %v1145_v15 }
 0x18c   : > { %v756_v45 = vld [vmem:[#allocation3] sm:$0xff] }
 0x258   : > { %v592_v38 = vpop.f32.mrb[4].mxu0 }
 0x259   : > { %v596_v39 = vadd.f32 %v592_v38, %v522_v37  ;;  %v1096_v40 = vpop.f32.mrb[5].mxu0 }
 0x25b   : > { %1260 = vtanh.f32 %v596_v39 }
 0x265   : > { %v1261_v44 = vpop.eup %1260 }
 0x266   : > { %598 = vst.msk [vmem:[#allocation3 + $0x8] sm:$0xff] %vm337_vm1, %v1261_v44  ;;  %1106 = vmatmul.mubr.msk.f32.vlgmr.msra.gmra.mrb[2].mxu1 %vm337_vm1, %v1261_v44 }
 0x267   : > { %1168 = vmatpush3.bf16.msra.mxu1 %v1165_v36  ;;  %1127 = vmatprep.mubr.msk.f32.mxu1 %vm337_vm1, %v756_v45 }
 0x268   : > { %1170 = vmatprep.subr.bf16.mxu1 %v1169_v43 }
 0x26b   : > { %1172 = vmatpush3.bf16.msra.mxu1 %v1169_v43 }
 0x26d   : > { %v757_v46 = vld [vmem:[#allocation3 + $0x8] sm:$0xff] }
 0x26e   : > { %1128 = vmatmul.mubr.msk.f32.vlgmr.msra.gmra.mrb[4].mxu1 %vm337_vm1, %v757_v46 }
 0x339   : > { %v670_v48 = vpop.f32.mrb[2].mxu1 }
 0x33a   : > { %v674_v49 = vadd.f32 %v670_v48, %v600_v47  ;;  %v1107_v50 = vpop.f32.mrb[3].mxu1 }
 0x33c   : > { %1262 = vtanh.f32 %v674_v49 }
 0x341   : > { %v1129_v52 = vpop.f32.mrb[4].mxu1 }
 0x342   : > { %v855_v53 = vadd.f32 %v1129_v52, %v1013_v51  ;;  %v849_v54 = vpop.f32.mrb[5].mxu1 }
 0x343   : > { %v850_v55 = vadd.f32 %v1013_v51, %v849_v54 }
 0x344   : > { %869 = vst [vmem:[%s1728_s29 + $0x8] sm:$0xff] %v855_v53 }
 0x345   : > { %868 = vst [vmem:[%s1728_s29] sm:$0xff] %v850_v55 }
 0x346   : > { %v1263_v56 = vpop.eup %1262 }
 0x347   : > { %676 = vst.msk [vmem:[#allocation3 + $0x10] sm:$0xff] %vm337_vm1, %v1263_v56  ;;  %1117 = vmatmul.mubr.msk.f32.vlgmr.msra.gmra.mrb[6].mxu0 %vm337_vm1, %v1263_v56 }
 0x34e   : > { %v758_v57 = vld [vmem:[#allocation3 + $0x10] sm:$0xff] }
 0x34f   : > { %1130 = vmatprep.mubr.msk.f32.mxu1 %vm337_vm1, %v758_v57 }
 0x41a   : > { %v748_v59 = vpop.f32.mrb[6].mxu0 }
 0x41b   : > { %v752_v60 = vadd.f32 %v748_v59, %v678_v58  ;;  %v1118_v61 = vpop.f32.mrb[7].mxu0 }
 0x41d   : > { %1264 = vtanh.f32 %v752_v60 }
 0x427   : > { %v1265_v62 = vpop.eup %1264 }
 0x428   : > { %754 = vst.msk [vmem:[#allocation3 + $0x18] sm:$0xff] %vm337_vm1, %v1265_v62  ;;  %755 = vst.msk [vmem:[#allocation2] sm:$0xff] %vm337_vm1, %v1265_v62 }
 0x42f   : > { %v759_v63 = vld [vmem:[#allocation3 + $0x18] sm:$0xff] }
 0x430   : > { %1131 = vmatmul.mubr.msk.f32.gmra.mrb[6].mxu1 %vm337_vm1, %v759_v63 }
 0x503   : > { %v1132_v0 = vpop.f32.mrb[6].mxu1 }
 0x504   : > { %v865_v1 = vadd.f32 %v1132_v0, %v1013_v51  ;;  %v859_v2 = vpop.f32.mrb[7].mxu1 }
 0x505   : > { %v860_v3 = vadd.f32 %v1013_v51, %v859_v2 }
 0x506   : > { %871 = vst [vmem:[%s1728_s29 + $0x18] sm:$0xff] %v865_v1 }
 0x507   : > { %870 = vst [vmem:[%s1728_s29 + $0x10] sm:$0xff] %v860_v3 }
 0x508   : > { %1393 = shalt.err (!%p1390_p10)
}
 0x509   : > { %s1394_s29 = scalar_lea.hbm %s1774_s12, 512  ;;  %s1398_s9 = scalar_lea.hbm %s1828_s6, 1024 }
 0x50a   : > { %p1395_p3 = scmp.ne.s32.totalorder %s1774_s12, %s1394_s29  ;;  %p1399_p0 = scmp.lt.u32.totalorder %s1774_s12, %s1828_s6 }
 0x50b   : > { %p1400_p6 = scmp.lt.u32.totalorder %s1398_s9, %s1394_s29  ;;  %p1402_p11 = scmp.lt.u32.totalorder %s1394_s29, %s1774_s12 }
 0x50c   : > { %p1396_p12 = pnand %p1395_p3, %p1659_p5 }
 0x50d   : > { %p1401_p8 = por %p1400_p6, %p1399_p0 }
 0x50e   : > { %p1397_p9 = pneg %p1396_p12 }
 0x50f   : > { %p1403_p7 = por %p1402_p11, %p1401_p8 }
 0x511   : > { %p1404_p13 = pnand %p1403_p7, %p1397_p9 }
 0x513   : > { %1407 = shalt.err (!%p1404_p13)
}
 0x514   : > { %s1467_s8 = smov 128   ;;  %s1468_s17 = smov 8  }
 0x515   : > { %1187 = dma.vmem_to_hbm [thread:$0]  (%p1659_p5), %s1776_s11, 512, %s1774_s12, %s873_s20, %s1467_s8, %s1467_s8, %s1468_s17  }
 0x516 PF: > { %s901_s19 = sand.u32 1, %s1442_s21   ;;  %p1847_p1 = scmp.ne.s32.totalorder %s1833_s28, 0 }
 0x517   : > { %p1848_p2 = scmp.ge.s32.totalorder %s1454_s24, 2  ;;  %s902_s25 = scalar_lea.sflag [#allocation6], %s901_s19 }
 0x519   : > { %p1204_p4 = pnand %p1848_p2, %p1847_p1 }
 0x51b   : > { %1437 = dma.done.wait (!%p1204_p4), %s902_s25, 512  }
 0x51c   : > { %1439 = vsyncadd (!%p1204_p4), %s902_s25, 4294966784  ;;  %p21_p10 = scmp.ge.s32.totalorder %s1645_s18, 4   ;;  %s1849_s21 = smov %s1446_s22 }
 0x51d   : > { %s1850_s22 = smov %s1450_s23  ;;  %s1851_s23 = smov %s1655_s14 }
 0x51e   : > { %s1852_s24 = smov %s1645_s18  ;;  %23 = sbr.rel (!%p21_p10) target bundleno = 7 (0x7), region = 108 }
 0x525   :  { %907 = vsyncpa [#allocation5], 1 }
 0x526   :  { %909 = vsyncpa [#allocation5 + $0x1], 1 }
 0x527   :  { %910 = vsyncpa [#allocation8], 1 }
 0x528   :  { %911 = vsyncpa [#allocation11], 1 }
 0x529   :  { %912 = vsyncpa [#allocation6], 1 }
 0x52a   :  { %914 = vsyncpa [#allocation6 + $0x1], 1 }

</bundles_post_ra>
